<compile_context>
chip_gen: v7x
topology: tpu7x:2x2x1
jax: 0.10.0
libtpu: 0.0.40
codegen_flags: <defaults>
</compile_context>

<pallas_src>
import functools

import jax
import jax.numpy as jnp
from jax.experimental import pallas as pl
from jax.experimental.pallas import tpu as pltpu

EPS = 1e-8          # torch.nn.CosineSimilarity default eps (clamps norm product)
_SQ_FLOOR = 1e-30   # avoid rsqrt(0) -> inf on all-zero (padded) rows
_MAX_TK = 2048      # reduction-tile cap (keeps blocks well inside VMEM)
_TILE_CANDIDATES = (512, 384, 256, 128)


def _round_up(x, m):
    return ((x + m - 1) // m) * m


def _tile_and_pad(dim, align, target=512):
    """Pick an output-axis tile size and the zero-padded dim it divides."""
    padded = _round_up(dim, align)
    if padded <= target:
        return padded, padded
    best_t, best_p = None, None
    for t in _TILE_CANDIDATES:            # all multiples of 128, descending
        p = _round_up(dim, t)
        if best_p is None or p < best_p:  # min padding, tie -> larger tile
            best_t, best_p = t, p
    return best_t, best_p


def _finalize(dot_f32, nx2, ny2, inv_temp):
    """dot / max(||x||*||y||, eps) / temp, via inverse norms (no divide)."""
    inv_nx = jax.lax.rsqrt(jnp.maximum(nx2, _SQ_FLOOR))   # (tm, 1)  f32
    inv_ny = jax.lax.rsqrt(jnp.maximum(ny2, _SQ_FLOOR))   # (1, tn)  f32
    # Fold 1/temp into the per-row factor; 1/max(a*b, eps) == min(1/a * 1/b, 1/eps).
    if inv_temp >= 0.0:
        inv = jnp.minimum((inv_nx * inv_temp) * inv_ny, inv_temp / EPS)
    else:
        inv = jnp.maximum((inv_nx * inv_temp) * inv_ny, inv_temp / EPS)
    return dot_f32 * inv


def _partial_sums(x_ref, y_ref, mxu_dtype):
    """Per-k-step dot tile and x/y sum-of-squares (norm path kept in f32)."""
    xv = x_ref[...]
    yv = y_ref[...]
    xm = xv if mxu_dtype is None else xv.astype(mxu_dtype)
    ym = yv if mxu_dtype is None else yv.astype(mxu_dtype)

    # MXU: contract hidden dim of both operands (no y.T tile), f32 accumulation.
    dot = jax.lax.dot_general(
        xm, ym, dimension_numbers=(((1,), (1,)), ((), ())),
        preferred_element_type=jnp.float32)                       # (tm, tn)

    xf = xv.astype(jnp.float32)
    yf = yv.astype(jnp.float32)
    nx2 = jnp.sum(xf * xf, axis=-1, keepdims=True)                # (tm, 1)
    # Lane-oriented y sum-of-squares via a 1-row matmul -> no in-kernel transpose.
    ones_row = jnp.ones((1, yf.shape[1]), jnp.float32)
    ny2 = jax.lax.dot_general(
        ones_row, yf * yf, dimension_numbers=(((1,), (1,)), ((), ())),
        preferred_element_type=jnp.float32)                       # (1, tn)
    return dot, nx2, ny2


# ---------------------------------------------------------------------------
# Single reduction step (k-grid == 1): no scratch, epilogue runs immediately.
# ---------------------------------------------------------------------------
def _sim_kernel_single(x_ref, y_ref, o_ref, *, inv_temp, mxu_dtype):
    dot, nx2, ny2 = _partial_sums(x_ref, y_ref, mxu_dtype)
    o_ref[...] = _finalize(dot, nx2, ny2, inv_temp).astype(o_ref.dtype)


# ---------------------------------------------------------------------------
# Multi-step reduction over the hidden dim: resident f32 accumulators.
# ---------------------------------------------------------------------------
def _sim_kernel_acc(x_ref, y_ref, o_ref, acc_ref, nx2_ref, ny2_ref, *,
                    inv_temp, mxu_dtype):
    k = pl.program_id(2)

    @pl.when(k == 0)
    def _():
        acc_ref[...] = jnp.zeros_like(acc_ref)
        nx2_ref[...] = jnp.zeros_like(nx2_ref)
        ny2_ref[...] = jnp.zeros_like(ny2_ref)

    dot, nx2, ny2 = _partial_sums(x_ref, y_ref, mxu_dtype)
    acc_ref[...] += dot
    nx2_ref[...] += nx2
    ny2_ref[...] += ny2

    @pl.when(k == pl.num_programs(2) - 1)
    def _():
        o_ref[...] = _finalize(acc_ref[...], nx2_ref[...], ny2_ref[...],
                               inv_temp).astype(o_ref.dtype)


def similarity(x, y, temp, *, use_bf16_matmul=True):
    """Pallas equivalent of Similarity(temp)(x[:, None, :], y[None, :, :]).

    x: (Bx, H), y: (By, H)  ->  (Bx, By) in promote_types(x.dtype, y.dtype)
    """
    assert x.ndim == 2 and y.ndim == 2 and x.shape[1] == y.shape[1]
    Bx, H = x.shape
    By, _ = y.shape
    out_dtype = jnp.promote_types(x.dtype, y.dtype)
    inv_temp = float(1.0 / temp)

    mxu_dtype = None
    if use_bf16_matmul and x.dtype == jnp.float32 and y.dtype == jnp.float32:
        mxu_dtype = jnp.bfloat16

    # ---- Tile selection + zero padding (blocks stay MXU-shaped & VMEM-bounded).
    Hp = _round_up(H, 128)
    if Hp <= _MAX_TK:
        tk = Hp                                # single reduction step
    else:
        tk = _MAX_TK
        Hp = _round_up(Hp, tk)

    tm, Bxp = _tile_and_pad(Bx, align=8)       # output rows (sublane axis)
    tn, Byp = _tile_and_pad(By, align=128)     # output cols (lane-dense)

    grid_i, grid_j, grid_k = Bxp // tm, Byp // tn, Hp // tk

    # v7x has 2 TensorCores: make sure there are >= 2 parallel output tiles.
    if grid_i * grid_j == 1:
        if tm >= 16 and tm % 16 == 0:
            tm //= 2
            grid_i = 2
        elif tn >= 256 and tn % 256 == 0:
            tn //= 2
            grid_j = 2

    xp = x if (Bxp == Bx and Hp == H) else jnp.pad(x, ((0, Bxp - Bx), (0, Hp - H)))
    yp = y if (Byp == By and Hp == H) else jnp.pad(y, ((0, Byp - By), (0, Hp - H)))

    if grid_k == 1:
        kernel = functools.partial(_sim_kernel_single,
                                   inv_temp=inv_temp, mxu_dtype=mxu_dtype)
        out = pl.pallas_call(
            kernel,
            out_shape=jax.ShapeDtypeStruct((Bxp, Byp), out_dtype),
            grid_spec=pltpu.PrefetchScalarGridSpec(
                num_scalar_prefetch=0,
                grid=(grid_i, grid_j),
                in_specs=[
                    pl.BlockSpec((tm, tk), lambda i, j: (i, 0)),   # x tile
                    pl.BlockSpec((tn, tk), lambda i, j: (j, 0)),   # y tile
                ],
                out_specs=pl.BlockSpec((tm, tn), lambda i, j: (i, j)),
            ),
            compiler_params=pltpu.CompilerParams(
                dimension_semantics=("parallel", "parallel")),
        )(xp, yp)
    else:
        kernel = functools.partial(_sim_kernel_acc,
                                   inv_temp=inv_temp, mxu_dtype=mxu_dtype)
        out = pl.pallas_call(
            kernel,
            out_shape=jax.ShapeDtypeStruct((Bxp, Byp), out_dtype),
            grid_spec=pltpu.PrefetchScalarGridSpec(
                num_scalar_prefetch=0,
                grid=(grid_i, grid_j, grid_k),
                in_specs=[
                    pl.BlockSpec((tm, tk), lambda i, j, k: (i, k)),   # x tile
                    pl.BlockSpec((tn, tk), lambda i, j, k: (j, k)),   # y tile
                ],
                out_specs=pl.BlockSpec((tm, tn), lambda i, j, k: (i, j)),
                scratch_shapes=[
                    pltpu.VMEM((tm, tn), jnp.float32),   # dot accumulator
                    pltpu.VMEM((tm, 1), jnp.float32),    # sum x^2
                    pltpu.VMEM((1, tn), jnp.float32),    # sum y^2 (lane-oriented)
                ],
            ),
            compiler_params=pltpu.CompilerParams(
                dimension_semantics=("parallel", "parallel", "arbitrary")),
        )(xp, yp)

    if Bxp != Bx or Byp != By:
        out = out[:Bx, :By]
    return out


def _reference(x, y, temp, matmul_dtype=None):
    """Mirrors torch: cos(x[:, None, :], y[None, :, :], dim=-1) / temp."""
    xf = x.astype(jnp.float32)
    yf = y.astype(jnp.float32)
    if matmul_dtype is None:
        dot = xf @ yf.T
    else:  # model the bf16-operand MXU path (norms stay f32)
        dot = (x.astype(matmul_dtype).astype(jnp.float32)
               @ y.astype(matmul_dtype).astype(jnp.float32).T)
    nx = jnp.linalg.norm(xf, axis=-1, keepdims=True)
    ny = jnp.linalg.norm(yf, axis=-1, keepdims=True)
    return dot / jnp.maximum(nx * ny.T, EPS) / temp


if __name__ == "__main__":
    temp = 0.05  # typical SimCSE setting

    # 1) Small shape consistent with the module's forward (batch=8, hidden=32).
    kx, ky = jax.random.split(jax.random.PRNGKey(0))
    B, H = 8, 32
    x = jax.random.normal(kx, (B, H), dtype=jnp.float32)
    y = jax.random.normal(ky, (B, H), dtype=jnp.float32)

    out = jax.block_until_ready(similarity(x, y, temp, use_bf16_matmul=False))
    assert out.shape == (B, B)
    assert jnp.allclose(out, _reference(x, y, temp), atol=1e-4, rtol=1e-4)

    out_bf = jax.block_until_ready(similarity(x, y, temp))  # default bf16 MXU path
    assert jnp.allclose(out_bf, _reference(x, y, temp, jnp.bfloat16),
                        atol=5e-3, rtol=5e-3)
    assert jnp.allclose(out_bf, _reference(x, y, temp), atol=0.2, rtol=0.1)

    # 2) Multi-step reduction path (H > 2048 -> k-grid of 2, resident accumulators).
    k2x, k2y = jax.random.split(jax.random.PRNGKey(1))
    x2 = jax.random.normal(k2x, (8, 4096), dtype=jnp.float32)
    y2 = jax.random.normal(k2y, (8, 4096), dtype=jnp.float32)
    out2 = jax.block_until_ready(similarity(x2, y2, temp, use_bf16_matmul=False))
    assert jnp.allclose(out2, _reference(x2, y2, temp), atol=1e-3, rtol=1e-3)
    out2b = jax.block_until_ready(similarity(x2, y2, temp))
    assert jnp.allclose(out2b, _reference(x2, y2, temp, jnp.bfloat16),
                        atol=5e-3, rtol=5e-3)

    # 3) Non-divisible shapes (padding + output slice + 2-way row split).
    k3x, k3y = jax.random.split(jax.random.PRNGKey(2))
    x3 = jax.random.normal(k3x, (300, 384), dtype=jnp.float32)
    y3 = jax.random.normal(k3y, (200, 384), dtype=jnp.float32)
    out3 = jax.block_until_ready(similarity(x3, y3, temp, use_bf16_matmul=False))
    assert out3.shape == (300, 200)
    assert jnp.allclose(out3, _reference(x3, y3, temp), atol=1e-3, rtol=1e-3)

    # 4) Multi-tile (i, j) output grid.
    k4x, k4y = jax.random.split(jax.random.PRNGKey(3))
    x4 = jax.random.normal(k4x, (640, 256), dtype=jnp.float32)
    y4 = jax.random.normal(k4y, (768, 256), dtype=jnp.float32)
    out4 = jax.block_until_ready(similarity(x4, y4, temp))
    assert out4.shape == (640, 768)
    assert jnp.allclose(out4, _reference(x4, y4, temp, jnp.bfloat16),
                        atol=5e-3, rtol=5e-3)

    print("KERNEL_OK")
</pallas_src>

<mosaic_0001>
module attributes {stable_mosaic.version = 11 : i64} {
  func.func @_sim_kernel_single(%arg0: i32, %arg1: i32, %arg2: memref<8x128xf32, #tpu.memory_space<vmem>>, %arg3: memref<128x128xf32, #tpu.memory_space<vmem>>, %arg4: memref<8x128xf32, #tpu.memory_space<vmem>>) attributes {dimension_semantics = [#tpu.dimension_semantics<parallel>, #tpu.dimension_semantics<parallel>], iteration_bounds = array<i64: 1, 1>, scalar_prefetch = 0 : i64, scratch_operands = 0 : i64, tpu.core_type = #tpu.core_type<tc>, window_params = [{transform_indices = @transform_0, window_bounds = array<i64: 8, 128>}, {transform_indices = @transform_1, window_bounds = array<i64: 128, 128>}, {transform_indices = @transform_2, window_bounds = array<i64: 8, 128>}]} {
    %c0 = arith.constant 0 : index
    %c0_0 = arith.constant 0 : index
    %0 = vector.load %arg2[%c0, %c0_0] : memref<8x128xf32, #tpu.memory_space<vmem>>, vector<8x128xf32>
    %c0_1 = arith.constant 0 : index
    %c0_2 = arith.constant 0 : index
    %1 = vector.load %arg3[%c0_1, %c0_2] : memref<128x128xf32, #tpu.memory_space<vmem>>, vector<128x128xf32>
    %cst = arith.constant dense<0.000000e+00> : vector<8x128xf32>
    %2 = tpu.matmul %0, %1, %cst {dimension_numbers = #tpu.dot_dimension_numbers<[1], [1], [0], [0], [0, 0, 1, 0], [], []>} : vector<8x128xf32>, vector<128x128xf32>, vector<8x128xf32> -> vector<8x128xf32>
    %3 = arith.mulf %0, %0 : vector<8x128xf32>
    %cst_3 = arith.constant dense<0.000000e+00> : vector<8xf32>
    %4 = vector.multi_reduction <add>, %3, %cst_3 [1] : vector<8x128xf32> to vector<8xf32>
    %5 = vector.shape_cast %4 : vector<8xf32> to vector<8x1xf32>
    %cst_4 = arith.constant 1.000000e+00 : f32
    %6 = vector.broadcast %cst_4 : f32 to vector<1x128xf32>
    %7 = arith.mulf %1, %1 : vector<128x128xf32>
    %cst_5 = arith.constant dense<0.000000e+00> : vector<1x128xf32>
    %8 = tpu.matmul %6, %7, %cst_5 {dimension_numbers = #tpu.dot_dimension_numbers<[1], [1], [0], [0], [0, 0, 1, 0], [], []>} : vector<1x128xf32>, vector<128x128xf32>, vector<1x128xf32> -> vector<1x128xf32>
    %cst_6 = arith.constant 1.000000e-30 : f32
    %9 = vector.broadcast %cst_6 : f32 to vector<8x1xf32>
    %10 = arith.maximumf %5, %9 : vector<8x1xf32>
    %11 = math.rsqrt %10 : vector<8x1xf32>
    %cst_7 = arith.constant 1.000000e-30 : f32
    %12 = vector.broadcast %cst_7 : f32 to vector<1x128xf32>
    %13 = arith.maximumf %8, %12 : vector<1x128xf32>
    %14 = math.rsqrt %13 : vector<1x128xf32>
    %cst_8 = arith.constant 2.000000e+01 : f32
    %15 = vector.broadcast %cst_8 : f32 to vector<8x1xf32>
    %16 = arith.mulf %11, %15 : vector<8x1xf32>
    %17 = vector.broadcast %16 : vector<8x1xf32> to vector<8x128xf32>
    %18 = vector.broadcast %14 : vector<1x128xf32> to vector<8x128xf32>
    %19 = arith.mulf %17, %18 : vector<8x128xf32>
    %cst_9 = arith.constant 2.000000e+09 : f32
    %20 = vector.broadcast %cst_9 : f32 to vector<8x128xf32>
    %21 = arith.minimumf %19, %20 : vector<8x128xf32>
    %22 = arith.mulf %2, %21 : vector<8x128xf32>
    %c0_10 = arith.constant 0 : index
    %c0_11 = arith.constant 0 : index
    %23 = vector.load %arg4[%c0_10, %c0_11] : memref<8x128xf32, #tpu.memory_space<vmem>>, vector<8x128xf32>
    tpu.vector_store %arg4[%c0_10, %c0_11], %22 {strides = array<i32>} : memref<8x128xf32, #tpu.memory_space<vmem>>, vector<8x128xf32>,
    return
  }
  func.func @transform_0(%arg0: i32, %arg1: i32) -> (i32, i32) {
    %c0_i32 = arith.constant 0 : i32
    %c0_i32_0 = arith.constant 0 : i32
    return %arg0, %c0_i32 : i32, i32
  }
  func.func @transform_1(%arg0: i32, %arg1: i32) -> (i32, i32) {
    %c0_i32 = arith.constant 0 : i32
    %c0_i32_0 = arith.constant 0 : i32
    return %arg1, %c0_i32 : i32, i32
  }
  func.func @transform_2(%arg0: i32, %arg1: i32) -> (i32, i32) {
    %c0_i32 = arith.constant 0 : i32
    return %arg0, %arg1 : i32, i32
  }
}

</mosaic_0001>

<bundles_post_ra>
// kernel: tpu_custom_call.1
= control target key start
LH: loop header
LB: loop body
LE: loop exit
PB: predicated region body
PF: predicated region fallthrough
CT: control target
= control target key end

     0   :  { %7 = vsyncpa [#allocation3], 0  ;;  %s568_s0 = inlined_call_operand.hbm [shape: f32[8,128], index: 0, kind: input, shape index: {}]   ;;  %s569_s1 = inlined_call_operand.hbm [shape: f32[128,128], index: 1, kind: input, shape index: {}]   ;;  %s570_s2 = inlined_call_operand.hbm [shape: f32[8,128], index: 2, kind: output, shape index: {}]  }
   0x1   :  { %8 = vsyncpa [#allocation6], 0 }
   0x2   :  { %9 = vsyncpa [#allocation4], 0  ;;  %s480_s9 = smov [#allocation2]   ;;  %s481_s11 = smov [#allocation5]  }
   0x3   :  { %s16_s10 = sshll.u32 %s480_s9, 4  ;;  %s25_s12 = sshll.u32 %s481_s11, 4  ;;  %s17_s10 = int_to_ptr.vmem [resolvable:$true] %s16_s10  ;;  %s504_s12 = int_to_ptr.vmem [resolvable:$true] %s25_s12 }
   0x4   :  { %s408_s15 = scalar_lea.hbm %s568_s0, 128 }
   0x5   :  { %p409_p0 = scmp.ne.s32.totalorder %s568_s0, %s408_s15  ;;  %p412_p1 = scmp.lt.u32.totalorder %s408_s15, %s568_s0 }
   0x7   :  { %p414_p2 = pnand %p412_p1, %p409_p0 }
   0x9   :  { %417 = shalt.err (!%p414_p2)
}
   0xa   :  { %s418_s20 = scalar_lea.vmem %s17_s10, 128  ;;  %p423_p4 = scmp.lt.s32.totalorder %s17_s10, %s17_s10 }
   0xb   :  { %p419_p3 = scmp.ne.s32.totalorder %s17_s10, %s418_s20  ;;  %p424_p5 = scmp.lt.s32.totalorder %s418_s20, %s418_s20 }
   0xd   :  { %p425_p6 = por %p424_p5, %p423_p4 }
   0xf   :  { %p426_p7 = pnand %p425_p6, %p419_p3 }
  0x11   :  { %429 = shalt.err (!%p426_p7)
}
  0x12   :  { %19 = dma.hbm_to_vmem [thread:$0]  %s568_s0, 128, %s17_s10, [#allocation3]  }
  0x13   :  { %s430_s25 = scalar_lea.hbm %s569_s1, 2048 }
  0x14   :  { %p431_p8 = scmp.ne.s32.totalorder %s569_s1, %s430_s25  ;;  %p434_p9 = scmp.lt.u32.totalorder %s430_s25, %s569_s1 }
  0x16   :  { %p436_p10 = pnand %p434_p9, %p431_p8 }
  0x18   :  { %439 = shalt.err (!%p436_p10)
}
  0x19   :  { %s440_s30 = scalar_lea.vmem %s504_s12, 2048  ;;  %p445_p12 = scmp.lt.s32.totalorder %s504_s12, %s504_s12 }
  0x1a   :  { %p441_p11 = scmp.ne.s32.totalorder %s504_s12, %s440_s30  ;;  %p446_p13 = scmp.lt.s32.totalorder %s440_s30, %s440_s30 }
  0x1c   :  { %p447_p0 = por %p446_p13, %p445_p12 }
  0x1e   :  { %p448_p1 = pnand %p447_p0, %p441_p11 }
  0x20   :  { %451 = shalt.err (!%p448_p1)
}
  0x21   :  { %s482_s0 = smov 128   ;;  %s483_s3 = smov 8  }
  0x22   :  { %31 = dma.hbm_to_vmem [thread:$0]  %s569_s1, 2048, %s504_s12, [#allocation6], %s482_s0, %s482_s0, %s483_s3  }
  0x23   :  { %474 = dma.done.wait [#allocation3], 128  }
  0x24   :  { %475 = vsyncadd [#allocation3], 4294967168 }
  0x25   :  { %476 = dma.done.wait [#allocation6], 2048  }
  0x26   :  { %477 = vsyncadd [#allocation6], 4294965248  ;;  %v484_v0 = vmov 0.0|0.0   ;;  %vm485_vm0 = vmmov 0   ;;  %v486_v1 = vmov 0.0   ;;  %v39_v2 = vld [vmem:[#allocation5] sm:$0xff]  ;;  %v219_v60 = vlaneseq }
  0x27   :  { %371 = vmatprep.subr.bf16.mxu1 %v484_v0  ;;  %347 = vmatprep.subr.bf16.mxu0 %v484_v0  ;;  %v40_v3 = vld [vmem:[#allocation5 + $0x8] sm:$0xff]  ;;  %v128_v4 = vmul.f32 %v39_v2, %v39_v2  ;;  %v41_v7 = vld [vmem:[#allocation5 + $0x10] sm:$0xff]  ;;  %v42_v8 = vld [vmem:[#allocation5 + $0x18] sm:$0xff]  ;;  %v487_v52 = vmov 1.0   ;;  %s488_s1 = smov [#allocation7]  }
  0x28   :  { %344 = vmatprep.mubr.msk.f32.mxu1 %vm485_vm0, %v486_v1  ;;  %309 = vmatprep.mubr.msk.f32.mxu0 %vm485_vm0, %v486_v1  ;;  %v129_v5 = vmul.f32 %v40_v3, %v40_v3  ;;  %v348_v6 = vpack.c.bf16 %v40_v3, %v39_v2  ;;  %v130_v10 = vmul.f32 %v41_v7, %v41_v7  ;;  %v539_v13 = vld [vmem:[#allocation2] sm:$0xff]  ;;  %v43_v16 = vld [vmem:[#allocation5 + $0x20] sm:$0xff]  ;;  %v44_v17 = vld [vmem:[#allocation5 + $0x28] sm:$0xff]  ;;  %v220_v61 = vshrl.u32 %v219_v60, 7  ;;  %s233_s6 = sshll.u32 %s488_s1, 4  ;;  %s234_s6 = int_to_ptr.vmem [resolvable:$true] %s233_s6 }
  0x29   :  { %v131_v11 = vmul.f32 %v42_v8, %v42_v8  ;;  %v351_v12 = vpack.c.bf16 %v42_v8, %v41_v7  ;;  %v125_v14 = vmul.f32 %v539_v13, %v539_v13  ;;  %v132_v18 = vmul.f32 %v43_v16, %v43_v16  ;;  %v45_v22 = vld [vmem:[#allocation5 + $0x30] sm:$0xff]  ;;  %v46_v23 = vld [vmem:[#allocation5 + $0x38] sm:$0xff]  ;;  %v47_v28 = vld [vmem:[#allocation5 + $0x40] sm:$0xff]  ;;  %s452_s7 = scalar_lea.vmem %s234_s6, 128  ;;  %p457_p3 = scmp.lt.s32.totalorder %s234_s6, %s234_s6 }
  0x2a   :  { %v372_v9 = vpack.c.bf16 %v129_v5, %v128_v4  ;;  %349 = vmatpush3.bf16.xpose.msra.mxu0 %v348_v6  ;;  %v133_v19 = vmul.f32 %v44_v17, %v44_v17  ;;  %v354_v20 = vpack.c.bf16 %v44_v17, %v43_v16  ;;  %v134_v24 = vmul.f32 %v45_v22, %v45_v22  ;;  %v48_v29 = vld [vmem:[#allocation5 + $0x48] sm:$0xff]  ;;  %v49_v34 = vld [vmem:[#allocation5 + $0x50] sm:$0xff]  ;;  %v50_v35 = vld [vmem:[#allocation5 + $0x58] sm:$0xff]  ;;  %p453_p2 = scmp.ne.s32.totalorder %s234_s6, %s452_s7  ;;  %p458_p4 = scmp.lt.s32.totalorder %s452_s7, %s452_s7 }
  0x2b   :  { %350 = vmatprep.subr.bf16.mxu0 %v484_v0  ;;  %v375_v15 = vpack.c.bf16 %v131_v11, %v130_v10  ;;  %126 = vadd.xlane.f32.xlu0 %v125_v14  ;;  %v135_v25 = vmul.f32 %v46_v23, %v46_v23  ;;  %v357_v26 = vpack.c.bf16 %v46_v23, %v45_v22  ;;  %v51_v40 = vld [vmem:[#allocation5 + $0x60] sm:$0xff]  ;;  %v52_v41 = vld [vmem:[#allocation5 + $0x68] sm:$0xff]  ;;  %v53_v46 = vld [vmem:[#allocation5 + $0x70] sm:$0xff]  ;;  %v221_v63 = vsub.s32 0, %v220_v61 }
  0x2c   :  { %373 = vmatpush3.bf16.xpose.msra.mxu1 %v372_v9  ;;  %v378_v21 = vpack.c.bf16 %v133_v19, %v132_v18  ;;  %v136_v30 = vmul.f32 %v47_v28, %v47_v28  ;;  %v137_v31 = vmul.f32 %v48_v29, %v48_v29  ;;  %v360_v32 = vpack.c.bf16 %v48_v29, %v47_v28  ;;  %v54_v47 = vld [vmem:[#allocation5 + $0x78] sm:$0xff]  ;;  %p459_p5 = por %p458_p4, %p457_p3 }
  0x2d   :  { %374 = vmatprep.subr.bf16.mxu1 %v484_v0  ;;  %v381_v27 = vpack.c.bf16 %v135_v25, %v134_v24  ;;  %v138_v36 = vmul.f32 %v49_v34, %v49_v34  ;;  %v139_v37 = vmul.f32 %v50_v35, %v50_v35  ;;  %v363_v38 = vpack.c.bf16 %v50_v35, %v49_v34 }
  0x2e   :  { %v384_v33 = vpack.c.bf16 %v137_v31, %v136_v30  ;;  %v140_v42 = vmul.f32 %v51_v40, %v51_v40  ;;  %v141_v43 = vmul.f32 %v52_v41, %v52_v41  ;;  %v366_v44 = vpack.c.bf16 %v52_v41, %v51_v40  ;;  %p460_p6 = pnand %p459_p5, %p453_p2 }
  0x2f   :  { %v387_v39 = vpack.c.bf16 %v139_v37, %v138_v36  ;;  %v142_v48 = vmul.f32 %v53_v46, %v53_v46  ;;  %v143_v49 = vmul.f32 %v54_v47, %v54_v47  ;;  %v369_v50 = vpack.c.bf16 %v54_v47, %v53_v46 }
  0x30   :  { %v390_v45 = vpack.c.bf16 %v141_v43, %v140_v42 }
  0x31   :  { %v393_v51 = vpack.c.bf16 %v143_v49, %v142_v48 }
  0x32   :  { %352 = vmatpush3.bf16.xpose.msra.mxu0 %v351_v12 }
  0x33   :  { %353 = vmatprep.subr.bf16.mxu0 %v484_v0 }
  0x34   :  { %376 = vmatpush3.bf16.xpose.msra.mxu1 %v375_v15 }
  0x35   :  { %377 = vmatprep.subr.bf16.mxu1 %v484_v0 }
  0x3a   :  { %355 = vmatpush3.bf16.xpose.msra.mxu0 %v354_v20 }
  0x3b   :  { %356 = vmatprep.subr.bf16.mxu0 %v484_v0 }
  0x3c   :  { %379 = vmatpush3.bf16.xpose.msra.mxu1 %v378_v21 }
  0x3d   :  { %380 = vmatprep.subr.bf16.mxu1 %v484_v0 }
  0x42   :  { %358 = vmatpush3.bf16.xpose.msra.mxu0 %v357_v26 }
  0x43   :  { %359 = vmatprep.subr.bf16.mxu0 %v484_v0 }
  0x44   :  { %382 = vmatpush3.bf16.xpose.msra.mxu1 %v381_v27 }
  0x45   :  { %383 = vmatprep.subr.bf16.mxu1 %v484_v0 }
  0x4a   :  { %361 = vmatpush3.bf16.xpose.msra.mxu0 %v360_v32 }
  0x4b   :  { %362 = vmatprep.subr.bf16.mxu0 %v484_v0 }
  0x4c   :  { %385 = vmatpush3.bf16.xpose.msra.mxu1 %v384_v33 }
  0x4d   :  { %386 = vmatprep.subr.bf16.mxu1 %v484_v0 }
  0x52   :  { %364 = vmatpush3.bf16.xpose.msra.mxu0 %v363_v38 }
  0x53   :  { %365 = vmatprep.subr.bf16.mxu0 %v484_v0 }
  0x54   :  { %388 = vmatpush3.bf16.xpose.msra.mxu1 %v387_v39 }
  0x55   :  { %389 = vmatprep.subr.bf16.mxu1 %v484_v0 }
  0x5a   :  { %367 = vmatpush3.bf16.xpose.msra.mxu0 %v366_v44 }
  0x5b   :  { %368 = vmatprep.subr.bf16.mxu0 %v484_v0 }
  0x5c   :  { %391 = vmatpush3.bf16.xpose.msra.mxu1 %v390_v45 }
  0x5d   :  { %392 = vmatprep.subr.bf16.mxu1 %v484_v0 }
  0x62   :  { %370 = vmatpush3.bf16.xpose.msra.mxu0 %v369_v50 }
  0x64   :  { %394 = vmatpush3.bf16.xpose.msra.mxu1 %v393_v51 }
  0x69   :  { %310 = vmatmul.mubr.f32.vlgmr.msra.gmra.mrb[0].mxu0 %v539_v13 }
  0x6b   :  { %345 = vmatmul.mubr.f32.vlgmr.msra.gmra.mrb[0].mxu1 %v487_v52 }
  0xb8   :  { %v127_v53 = vpop.xlane.xlu0 %126 }
  0xb9   :  { %v214_v54 = vmax.f32 %v127_v53, 1e-30 }
  0xbb   :  { %404 = vrsqrt.f32 %v214_v54 }
  0xc5   :  { %v405_v62 = vpop.eup %404 }
  0xc6   :  { %v218_v0 = vmul.f32 20.0, %v405_v62 }
 0x13c   :  { %v121_v55 = vpop.f32.mrb[0].mxu0 }
 0x13d   :  { %v311_v56 = vpop.f32.mrb[1].mxu0 }
 0x13e   :  { %v210_v57 = vpop.f32.mrb[0].mxu1 }
 0x13f   :  { %v216_v58 = vmax.f32 %v210_v57, 1e-30  ;;  %v346_v59 = vpop.f32.mrb[1].mxu1 }
 0x141   :  { %406 = vrsqrt.f32 %v216_v58 }
 0x14b   :  { %v407_v1 = vpop.eup %406 }
 0x14c   :  { %v222_v2 = vrot.slane %v407_v1, %v221_v63 }
 0x14e   :  { %v223_v3 = vmul.f32 %v222_v2, %v218_v0 }
 0x150   :  { %v224_v4 = vmin.f32 %v223_v3, 2e+09 }
 0x152   :  { %v225_v5 = vmul.f32 %v224_v4, %v121_v55 }
 0x154   :  { %226 = vst [vmem:[#allocation7] sm:$0xff] %v225_v5 }
 0x155   :  { %463 = shalt.err (!%p460_p6)
}
 0x156   :  { %s464_s10 = scalar_lea.hbm %s570_s2, 128 }
 0x157   :  { %p465_p7 = scmp.ne.s32.totalorder %s570_s2, %s464_s10  ;;  %p468_p8 = scmp.lt.u32.totalorder %s464_s10, %s570_s2 }
 0x159   :  { %p470_p9 = pnand %p468_p8, %p465_p7 }
 0x15b   :  { %473 = shalt.err (!%p470_p9)
}
 0x15c   :  { %236 = dma.vmem_to_hbm [thread:$0]  %s234_s6, 128, %s570_s2, [#allocation4]  }
 0x15d   :  { %478 = dma.done.wait [#allocation4], 128  }
 0x15e   :  { %479 = vsyncadd [#allocation4], 4294967168 }
 0x15f   :  { %240 = vsyncpa [#allocation3], 1 }
 0x160   :  { %241 = vsyncpa [#allocation6], 1 }
 0x161   :  { %242 = vsyncpa [#allocation4], 1 }

</bundles_post_ra>
